<compile_context>
chip_gen: v5e
topology: v5e:2x2
jax: 0.10.0
libtpu: 0.0.40
codegen_flags: <defaults>
</compile_context>

<pallas_src>
import functools

import jax
import jax.numpy as jnp
import numpy as np
from jax.experimental import pallas as pl
from jax.experimental.pallas import tpu as pltpu

LANE = 128


def _round_up(x: int, m: int) -> int:
    return ((x + m - 1) // m) * m


# ----------------------------- Pallas kernel --------------------------------


def _ppo_actor_kernel(x_ref, w1_ref, b1_ref, w2_ref, b2_ref, w3_ref, b3_ref,
                      o_ref, *, continuous: bool):
    """Fused 3-layer MLP + head for one batch tile; weights stay resident."""
    # Cast the state tile f32 -> bf16 in VMEM (no extra HBM pass in the
    # wrapper); MXU consumes bf16, accumulates in f32.
    x = x_ref[...].astype(jnp.bfloat16)                        # (TB, S)

    # Layer 1: Linear(S -> Hp) + Tanh
    h1 = jnp.dot(x, w1_ref[...], preferred_element_type=jnp.float32)
    h1 = jnp.tanh(h1 + b1_ref[...])                            # f32 (v5e-safe)

    # Layer 2: Linear(Hp -> Hp) + Tanh
    h2 = jnp.dot(h1.astype(jnp.bfloat16), w2_ref[...],
                 preferred_element_type=jnp.float32)
    h2 = jnp.tanh(h2 + b2_ref[...])

    # Layer 3: Linear(Hp -> Ap)
    z = jnp.dot(h2.astype(jnp.bfloat16), w3_ref[...],
                preferred_element_type=jnp.float32) + b3_ref[...]

    if continuous:
        out = jnp.tanh(z)
    else:
        # Padded action lanes carry b3 == -1e30 (baked in at prep time, padded
        # w3 columns are zero) so they vanish from the max and contribute
        # exp(...) == 0 to the sum -- no iota/where needed here.
        z_max = jnp.max(z, axis=-1, keepdims=True)
        e = jnp.exp(z - z_max)
        denom = jnp.sum(e, axis=-1, keepdims=True)
        out = e * pl.reciprocal(denom, approx=True)            # EUP vrcp

    o_ref[...] = out.astype(o_ref.dtype)                       # bf16 store


# ------------------------------- wrapper -------------------------------------


def _choose_tile_b(B: int) -> int:
    # Aim for >= 2 grid steps whenever B allows it (v7x megacore sharding of
    # the "parallel" batch axis), while capping tiles at 1024 rows so the
    # ~0.35us per-grid-step overhead is amortized on v5e/v6e.  Per-tile
    # activation footprint at TILE_B=1024 is a few hundred KiB -- trivially
    # within VMEM on all three generations.
    half = _round_up(max(1, pl.cdiv(B, 2)), 8)
    return max(8, min(1024, half))


def prepare_params(params, *, continuous: bool):
    """Pad hidden/action dims to lane multiples; cast weights to bf16.

    Input params use the logical (PyTorch) sizes, already in [in, out] layout:
      w1[S,H] b1[1,H] w2[H,H] b2[1,H] w3[H,A] b3[1,A]
    For the discrete head the padded b3 lanes are poisoned with -1e30 so the
    kernel's softmax needs no explicit mask.  Returns (padded params, A).
    """
    S, H = params["w1"].shape
    A = params["w3"].shape[1]
    Hp, Ap = _round_up(H, LANE), _round_up(A, LANE)

    def pad2(x, rows, cols):
        return jnp.pad(x, ((0, rows - x.shape[0]), (0, cols - x.shape[1])))

    b3 = pad2(params["b3"], 1, Ap).astype(jnp.float32)
    if (not continuous) and Ap != A:
        lane = jnp.arange(Ap)[None, :]
        b3 = jnp.where(lane < A, b3, jnp.float32(-1e30))

    prepped = {
        "w1": pad2(params["w1"], S, Hp).astype(jnp.bfloat16),
        "b1": pad2(params["b1"], 1, Hp).astype(jnp.float32),
        "w2": pad2(params["w2"], Hp, Hp).astype(jnp.bfloat16),
        "b2": pad2(params["b2"], 1, Hp).astype(jnp.float32),
        "w3": pad2(params["w3"], Hp, Ap).astype(jnp.bfloat16),
        "b3": b3,
    }
    return prepped, A


def ppo_actor_forward(state, prepped, action_dim, *, continuous: bool,
                      trim: bool = True):
    """state: [B, S] float32;  prepped: lane-padded bf16/f32 params.

    Returns [B, action_dim] bf16 (trim=True) or the padded [B, Ap] slab
    (trim=False; padded lanes are exactly 0).
    """
    B, S = state.shape
    Hp = prepped["w1"].shape[1]
    Ap = prepped["w3"].shape[1]

    TILE_B = _choose_tile_b(B)
    grid = (pl.cdiv(B, TILE_B),)   # ragged last tile handled by Pallas masking

    kernel = functools.partial(_ppo_actor_kernel, continuous=continuous)

    # Weights/biases: full-array blocks pinned at block (0,0) -> VMEM-resident
    # across the whole batch grid (no re-fetch).  State/output tile over batch.
    resident = lambda shape: pl.BlockSpec(shape, lambda i: (0, 0))

    flops = 2 * B * (S * Hp + Hp * Hp + Hp * Ap)
    transcendentals = B * (2 * Hp + Ap)
    bytes_accessed = (B * S * 4                               # state (f32)
                      + (S * Hp + Hp * Hp + Hp * Ap) * 2      # weights (bf16)
                      + (2 * Hp + Ap) * 4                     # biases (f32)
                      + B * Ap * 2)                           # output (bf16)

    # VMEM budget: resident weights/biases (double-buffered by the default
    # pipeliner even with a constant index_map), double-buffered state/output
    # tiles, plus f32 intermediates.  Only raise the scoped limit if needed.
    weight_bytes = (S * Hp + Hp * Hp + Hp * Ap) * 2 + (2 * Hp + Ap) * 4
    tile_bytes = TILE_B * S * 4 + TILE_B * Ap * 2
    interm_bytes = TILE_B * (2 * Hp + Ap) * 4
    footprint = 2 * (weight_bytes + tile_bytes) + interm_bytes
    vmem_limit_bytes = None
    if footprint > 16 * 1024 * 1024:
        vmem_limit_bytes = min(int(footprint * 1.25), 64 * 1024 * 1024)

    out = pl.pallas_call(
        kernel,
        out_shape=jax.ShapeDtypeStruct((B, Ap), jnp.bfloat16),
        grid=grid,
        in_specs=[
            pl.BlockSpec((TILE_B, S), lambda i: (i, 0)),   # state tile (f32)
            resident((S, Hp)),                             # w1
            resident((1, Hp)),                             # b1
            resident((Hp, Hp)),                            # w2
            resident((1, Hp)),                             # b2
            resident((Hp, Ap)),                            # w3
            resident((1, Ap)),                             # b3
        ],
        out_specs=pl.BlockSpec((TILE_B, Ap), lambda i: (i, 0)),
        compiler_params=pltpu.CompilerParams(
            dimension_semantics=("parallel",),
            vmem_limit_bytes=vmem_limit_bytes),
        cost_estimate=pl.CostEstimate(flops=flops,
                                      transcendentals=transcendentals,
                                      bytes_accessed=bytes_accessed),
    )(state, prepped["w1"], prepped["b1"], prepped["w2"], prepped["b2"],
      prepped["w3"], prepped["b3"])

    if trim:
        # Lane-sparse slice; prefer trim=False and consume the padded slab
        # downstream when possible (padded lanes are exactly 0).
        out = out[:, :action_dim]
    return out


# --------------------------- parameter init (JAX) ----------------------------


def _orthogonal(key, shape, gain):
    """Orthogonal init matching nn.init.orthogonal_ semantics (QR-based)."""
    rows, cols = shape
    flat_shape = (max(rows, cols), min(rows, cols))
    a = jax.random.normal(key, flat_shape, dtype=jnp.float32)
    q, r = jnp.linalg.qr(a)
    q = q * jnp.sign(jnp.diagonal(r))     # sign-fix for uniqueness
    if rows < cols:
        q = q.T
    return gain * q[:rows, :cols]


def make_params(key, state_dim, hidden_size, action_dim):
    k1, k2, k3 = jax.random.split(key, 3)
    gain = float(np.sqrt(2.0))
    # PyTorch Linear weight is [out, in]; init in that layout, transpose to
    # [in, out] for the kernel.
    w1 = _orthogonal(k1, (hidden_size, state_dim), gain).T
    w2 = _orthogonal(k2, (hidden_size, hidden_size), gain).T
    w3 = _orthogonal(k3, (action_dim, hidden_size), 0.01).T
    return {
        "w1": w1, "b1": jnp.zeros((1, hidden_size), jnp.float32),
        "w2": w2, "b2": jnp.zeros((1, hidden_size), jnp.float32),
        "w3": w3, "b3": jnp.zeros((1, action_dim), jnp.float32),
    }


# -------------------------------- reference ----------------------------------


def ppo_actor_ref(state, params, *, continuous: bool):
    """Pure-JAX reference mirroring the kernel's bf16-storage / f32-accumulate
    numerics (padding with zeros is mathematically inert)."""
    bf16, f32 = jnp.bfloat16, jnp.float32
    x = state.astype(bf16)
    w1 = params["w1"].astype(bf16)
    w2 = params["w2"].astype(bf16)
    w3 = params["w3"].astype(bf16)
    h1 = jnp.tanh(jnp.dot(x, w1, preferred_element_type=f32) + params["b1"])
    h2 = jnp.tanh(jnp.dot(h1.astype(bf16), w2,
                          preferred_element_type=f32) + params["b2"])
    z = jnp.dot(h2.astype(bf16), w3,
                preferred_element_type=f32) + params["b3"]
    if continuous:
        return jnp.tanh(z)
    return jax.nn.softmax(z, axis=-1)


# ---------------------------------- main --------------------------------------


if __name__ == "__main__":
    key = jax.random.PRNGKey(0)
    k_param, k_state = jax.random.split(key)

    B, STATE_DIM, HIDDEN, ACTION_DIM = 8, 16, 32, 8

    params = make_params(k_param, STATE_DIM, HIDDEN, ACTION_DIM)
    state = jax.random.normal(k_state, (B, STATE_DIM), dtype=jnp.float32)

    # Tolerances cover bf16 operand storage, bf16 output quantization and the
    # approx reciprocal in the softmax head.
    RTOL, ATOL = 1e-2, 1e-2

    # Discrete actor (softmax head).
    prepped_d, A = prepare_params(params, continuous=False)
    out_d = jax.block_until_ready(
        ppo_actor_forward(state, prepped_d, A, continuous=False))
    ref_d = ppo_actor_ref(state, params, continuous=False)
    out_d_f32 = np.asarray(out_d.astype(jnp.float32))
    np.testing.assert_allclose(out_d_f32, np.asarray(ref_d),
                               rtol=RTOL, atol=ATOL)
    np.testing.assert_allclose(out_d_f32.sum(-1), np.ones(B),
                               rtol=2e-2, atol=2e-2)

    # Continuous actor (tanh head).
    prepped_c, _ = prepare_params(params, continuous=True)
    out_c = jax.block_until_ready(
        ppo_actor_forward(state, prepped_c, A, continuous=True))
    ref_c = ppo_actor_ref(state, params, continuous=True)
    np.testing.assert_allclose(np.asarray(out_c.astype(jnp.float32)),
                               np.asarray(ref_c), rtol=RTOL, atol=ATOL)

    print("KERNEL_OK")
</pallas_src>

<mosaic_0001>
module attributes {stable_mosaic.version = 11 : i64} {
  func.func @_ppo_actor_kernel(%arg0: i32, %arg1: memref<8x16xf32, #tpu.memory_space<vmem>>, %arg2: memref<16x128xbf16, #tpu.memory_space<vmem>>, %arg3: memref<1x128xf32, #tpu.memory_space<vmem>>, %arg4: memref<128x128xbf16, #tpu.memory_space<vmem>>, %arg5: memref<1x128xf32, #tpu.memory_space<vmem>>, %arg6: memref<128x128xbf16, #tpu.memory_space<vmem>>, %arg7: memref<1x128xf32, #tpu.memory_space<vmem>>, %arg8: memref<8x128xbf16, #tpu.memory_space<vmem>>) attributes {dimension_semantics = [#tpu.dimension_semantics<parallel>], iteration_bounds = array<i64: 1>, scalar_prefetch = 0 : i64, scratch_operands = 0 : i64, tpu.core_type = #tpu.core_type<tc>, window_params = [{transform_indices = @transform_0, window_bounds = array<i64: 8, 16>}, {pipeline_mode = #tpu.pipeline_mode<synchronous>, transform_indices = @transform_1, window_bounds = array<i64: 16, 128>}, {pipeline_mode = #tpu.pipeline_mode<synchronous>, transform_indices = @transform_2, window_bounds = array<i64: 1, 128>}, {pipeline_mode = #tpu.pipeline_mode<synchronous>, transform_indices = @transform_3, window_bounds = array<i64: 128, 128>}, {pipeline_mode = #tpu.pipeline_mode<synchronous>, transform_indices = @transform_4, window_bounds = array<i64: 1, 128>}, {pipeline_mode = #tpu.pipeline_mode<synchronous>, transform_indices = @transform_5, window_bounds = array<i64: 128, 128>}, {pipeline_mode = #tpu.pipeline_mode<synchronous>, transform_indices = @transform_6, window_bounds = array<i64: 1, 128>}, {transform_indices = @transform_7, window_bounds = array<i64: 8, 128>}]} {
    %c0 = arith.constant 0 : index
    %c0_0 = arith.constant 0 : index
    %0 = vector.load %arg1[%c0, %c0_0] : memref<8x16xf32, #tpu.memory_space<vmem>>, vector<8x16xf32>
    %1 = arith.truncf %0 : vector<8x16xf32> to vector<8x16xbf16>
    %c0_1 = arith.constant 0 : index
    %c0_2 = arith.constant 0 : index
    %2 = vector.load %arg2[%c0_1, %c0_2] : memref<16x128xbf16, #tpu.memory_space<vmem>>, vector<16x128xbf16>
    %cst = arith.constant dense<0.000000e+00> : vector<8x128xf32>
    %3 = tpu.matmul %1, %2, %cst {dimension_numbers = #tpu.dot_dimension_numbers<[1], [0], [0], [1], [0, 0, 1, 1], [], []>} : vector<8x16xbf16>, vector<16x128xbf16>, vector<8x128xf32> -> vector<8x128xf32>
    %c0_3 = arith.constant 0 : index
    %c0_4 = arith.constant 0 : index
    %4 = vector.load %arg3[%c0_3, %c0_4] : memref<1x128xf32, #tpu.memory_space<vmem>>, vector<1x128xf32>
    %5 = vector.broadcast %4 : vector<1x128xf32> to vector<8x128xf32>
    %6 = arith.addf %3, %5 : vector<8x128xf32>
    %7 = math.tanh %6 : vector<8x128xf32>
    %8 = arith.truncf %7 : vector<8x128xf32> to vector<8x128xbf16>
    %c0_5 = arith.constant 0 : index
    %c0_6 = arith.constant 0 : index
    %9 = vector.load %arg4[%c0_5, %c0_6] : memref<128x128xbf16, #tpu.memory_space<vmem>>, vector<128x128xbf16>
    %cst_7 = arith.constant dense<0.000000e+00> : vector<8x128xf32>
    %10 = tpu.matmul %8, %9, %cst_7 {dimension_numbers = #tpu.dot_dimension_numbers<[1], [0], [0], [1], [0, 0, 1, 1], [], []>} : vector<8x128xbf16>, vector<128x128xbf16>, vector<8x128xf32> -> vector<8x128xf32>
    %c0_8 = arith.constant 0 : index
    %c0_9 = arith.constant 0 : index
    %11 = vector.load %arg5[%c0_8, %c0_9] : memref<1x128xf32, #tpu.memory_space<vmem>>, vector<1x128xf32>
    %12 = vector.broadcast %11 : vector<1x128xf32> to vector<8x128xf32>
    %13 = arith.addf %10, %12 : vector<8x128xf32>
    %14 = math.tanh %13 : vector<8x128xf32>
    %15 = arith.truncf %14 : vector<8x128xf32> to vector<8x128xbf16>
    %c0_10 = arith.constant 0 : index
    %c0_11 = arith.constant 0 : index
    %16 = vector.load %arg6[%c0_10, %c0_11] : memref<128x128xbf16, #tpu.memory_space<vmem>>, vector<128x128xbf16>
    %cst_12 = arith.constant dense<0.000000e+00> : vector<8x128xf32>
    %17 = tpu.matmul %15, %16, %cst_12 {dimension_numbers = #tpu.dot_dimension_numbers<[1], [0], [0], [1], [0, 0, 1, 1], [], []>} : vector<8x128xbf16>, vector<128x128xbf16>, vector<8x128xf32> -> vector<8x128xf32>
    %c0_13 = arith.constant 0 : index
    %c0_14 = arith.constant 0 : index
    %18 = vector.load %arg7[%c0_13, %c0_14] : memref<1x128xf32, #tpu.memory_space<vmem>>, vector<1x128xf32>
    %19 = vector.broadcast %18 : vector<1x128xf32> to vector<8x128xf32>
    %20 = arith.addf %17, %19 : vector<8x128xf32>
    %cst_15 = arith.constant dense<0xFF800000> : vector<8xf32>
    %21 = vector.multi_reduction <maximumf>, %20, %cst_15 [1] : vector<8x128xf32> to vector<8xf32>
    %22 = vector.shape_cast %21 : vector<8xf32> to vector<8x1xf32>
    %23 = vector.broadcast %22 : vector<8x1xf32> to vector<8x128xf32>
    %24 = arith.subf %20, %23 : vector<8x128xf32>
    %25 = math.exp %24 : vector<8x128xf32>
    %cst_16 = arith.constant dense<0.000000e+00> : vector<8xf32>
    %26 = vector.multi_reduction <add>, %25, %cst_16 [1] : vector<8x128xf32> to vector<8xf32>
    %27 = vector.shape_cast %26 : vector<8xf32> to vector<8x1xf32>
    %28 = tpu.reciprocal %27 {approx = true} : vector<8x1xf32> -> vector<8x1xf32>
    %29 = vector.broadcast %28 : vector<8x1xf32> to vector<8x128xf32>
    %30 = arith.mulf %25, %29 : vector<8x128xf32>
    %31 = arith.truncf %30 : vector<8x128xf32> to vector<8x128xbf16>
    %c0_17 = arith.constant 0 : index
    %c0_18 = arith.constant 0 : index
    %32 = vector.load %arg8[%c0_17, %c0_18] : memref<8x128xbf16, #tpu.memory_space<vmem>>, vector<8x128xbf16>
    tpu.vector_store %arg8[%c0_17, %c0_18], %31 {strides = array<i32>} : memref<8x128xbf16, #tpu.memory_space<vmem>>, vector<8x128xbf16>,
    return
  }
  func.func @transform_0(%arg0: i32) -> (i32, i32) {
    %c0_i32 = arith.constant 0 : i32
    %c0_i32_0 = arith.constant 0 : i32
    return %arg0, %c0_i32 : i32, i32
  }
  func.func @transform_1(%arg0: i32) -> (i32, i32) {
    %c0_i32 = arith.constant 0 : i32
    %c0_i32_0 = arith.constant 0 : i32
    %c0_i32_1 = arith.constant 0 : i32
    return %c0_i32, %c0_i32_0 : i32, i32
  }
  func.func @transform_2(%arg0: i32) -> (i32, i32) {
    %c0_i32 = arith.constant 0 : i32
    %c0_i32_0 = arith.constant 0 : i32
    %c0_i32_1 = arith.constant 0 : i32
    return %c0_i32, %c0_i32_0 : i32, i32
  }
  func.func @transform_3(%arg0: i32) -> (i32, i32) {
    %c0_i32 = arith.constant 0 : i32
    %c0_i32_0 = arith.constant 0 : i32
    %c0_i32_1 = arith.constant 0 : i32
    return %c0_i32, %c0_i32_0 : i32, i32
  }
  func.func @transform_4(%arg0: i32) -> (i32, i32) {
    %c0_i32 = arith.constant 0 : i32
    %c0_i32_0 = arith.constant 0 : i32
    %c0_i32_1 = arith.constant 0 : i32
    return %c0_i32, %c0_i32_0 : i32, i32
  }
  func.func @transform_5(%arg0: i32) -> (i32, i32) {
    %c0_i32 = arith.constant 0 : i32
    %c0_i32_0 = arith.constant 0 : i32
    %c0_i32_1 = arith.constant 0 : i32
    return %c0_i32, %c0_i32_0 : i32, i32
  }
  func.func @transform_6(%arg0: i32) -> (i32, i32) {
    %c0_i32 = arith.constant 0 : i32
    %c0_i32_0 = arith.constant 0 : i32
    %c0_i32_1 = arith.constant 0 : i32
    return %c0_i32, %c0_i32_0 : i32, i32
  }
  func.func @transform_7(%arg0: i32) -> (i32, i32) {
    %c0_i32 = arith.constant 0 : i32
    %c0_i32_0 = arith.constant 0 : i32
    return %arg0, %c0_i32 : i32, i32
  }
}

</mosaic_0001>

<bundles_post_ra>
// kernel: tpu_custom_call.1
= control target key start
LH: loop header
LB: loop body
LE: loop exit
PB: predicated region body
PF: predicated region fallthrough
CT: control target
= control target key end

     0   :  { %12 = vsyncpa [#allocation3], 0  ;;  %s619_s0 = inlined_call_operand.hbm [shape: f32[8,16], index: 0, kind: input, shape index: {}]   ;;  %s620_s1 = inlined_call_operand.hbm [shape: bf16[16,128], index: 1, kind: input, shape index: {}]   ;;  %s621_s2 = inlined_call_operand.vmem [shape: f32[1,128], index: 2, kind: input, shape index: {}]   ;;  %s622_s3 = inlined_call_operand.hbm [shape: bf16[128,128], index: 3, kind: input, shape index: {}]   ;;  %s623_s4 = inlined_call_operand.vmem [shape: f32[1,128], index: 4, kind: input, shape index: {}]   ;;  %s624_s5 = inlined_call_operand.hbm [shape: bf16[128,128], index: 5, kind: input, shape index: {}]   ;;  %s625_s6 = inlined_call_operand.vmem [shape: f32[1,128], index: 6, kind: input, shape index: {}]   ;;  %s626_s7 = inlined_call_operand.hbm [shape: bf16[8,128], index: 7, kind: output, shape index: {}]  }
   0x1   :  { %13 = vsyncpa [#allocation6], 0 }
   0x2   :  { %14 = vsyncpa [#allocation9], 0  ;;  %s31_s26 = sshll.u32 %s620_s1, 4  ;;  %s32_s26 = int_to_ptr.hbm [resolvable:$true] %s31_s26 }
   0x3   :  { %15 = vsyncpa [#allocation4], 0  ;;  %s548_s27 = smov [#allocation5]   ;;  %s21_s8 = sshll.u32 %s619_s0, 4  ;;  %s22_s8 = int_to_ptr.hbm [resolvable:$true] %s21_s8 }
   0x4   :  { %s33_s28 = sshll.u32 %s548_s27, 4  ;;  %s549_s9 = smov 64   ;;  %s34_s28 = int_to_ptr.vmem [resolvable:$true] %s33_s28 }
   0x5   :  { %s550_s10 = smov 4   ;;  %s551_s11 = smov [#allocation2]  }
   0x6   :  { %39 = dma.hbm_to_vmem [thread:$0]  %s32_s26, 128, %s34_s28, [#allocation6], %s549_s9, %s549_s9, %s550_s10  }
   0x7   :  { %s23_s12 = sshll.u32 %s551_s11, 4  ;;  %s46_s15 = sshll.u32 %s622_s3, 4  ;;  %s24_s12 = int_to_ptr.vmem [resolvable:$true] %s23_s12  ;;  %s47_s15 = int_to_ptr.hbm [resolvable:$true] %s46_s15 }
   0x8   :  { %26 = dma.hbm_to_vmem [thread:$0]  %s22_s8, 128, %s24_s12, [#allocation3]  }
   0x9   :  { %s61_s17 = sshll.u32 %s624_s5, 4  ;;  %s552_s18 = smov [#allocation7]   ;;  %s62_s17 = int_to_ptr.hbm [resolvable:$true] %s61_s17 }
   0xa   :  { %s48_s19 = sshll.u32 %s552_s18, 4  ;;  %s553_s0 = smov [#allocation8]   ;;  %s49_s19 = int_to_ptr.vmem [resolvable:$true] %s48_s19 }
   0xb   :  { %54 = dma.hbm_to_vmem [thread:$0]  %s47_s15, 1024, %s49_s19, [#allocation6], %s549_s9, %s549_s9, %s550_s10  }
   0xc   :  { %s63_s20 = sshll.u32 %s553_s0, 4  ;;  %s64_s20 = int_to_ptr.vmem [resolvable:$true] %s63_s20 }
   0xd   :  { %69 = dma.hbm_to_vmem [thread:$0]  %s62_s17, 1024, %s64_s20, [#allocation9], %s549_s9, %s549_s9, %s550_s10  }
   0xe   :  { %540 = dma.done.wait [#allocation3], 128  }
   0xf   :  { %541 = vsyncadd [#allocation3], 4294967168 }
  0x10   :  { %542 = dma.done.wait [#allocation6], 1152  }
  0x11   :  { %543 = vsyncadd [#allocation6], 4294966144 }
  0x12   :  { %544 = dma.done.wait [#allocation9], 1024  }
  0x13   :  { %545 = vsyncadd [#allocation9], 4294966272  ;;  %v385_v0 = vld [vmem:[#allocation5] sm:$0xff]  ;;  %v89_v1 = vld [vmem:[#allocation2] sm:$0xff]  ;;  %vm103_vm0 = vcmask 130048   ;;  %s304_s27 = sshll.u32 %s626_s7, 4  ;;  %s305_s27 = int_to_ptr.hbm [resolvable:$true] %s304_s27 }
  0x14   :  { %v393_v2 = vld [vmem:[#allocation7 + $0x38] sm:$0xff]  ;;  %v90_v3 = vpack.c.bf16 %v89_v1, %v89_v1  ;;  %114 = vmatpush.bf16.msra.mxu0 %v385_v0  ;;  %v392_v4 = vld [vmem:[#allocation7 + $0x30] sm:$0xff]  ;;  %v391_v5 = vld [vmem:[#allocation7 + $0x28] sm:$0xff] }
  0x15   :  { %190 = vmatpush.bf16.msra.mxu1 %v393_v2  ;;  %v390_v6 = vld [vmem:[#allocation7 + $0x20] sm:$0xff]  ;;  %v389_v7 = vld [vmem:[#allocation7 + $0x18] sm:$0xff]  ;;  %v388_v8 = vld [vmem:[#allocation7 + $0x10] sm:$0xff] }
  0x16   :  { %v387_v9 = vld [vmem:[#allocation7 + $0x8] sm:$0xff]  ;;  %v386_v10 = vld [vmem:[#allocation7] sm:$0xff]  ;;  %v401_v11 = vld [vmem:[#allocation8 + $0x38] sm:$0xff] }
  0x17   :  { %320 = vmatmul.msk.bf16.vlgmr.msra.gmra.mxu0 %vm103_vm0, %v90_v3  ;;  %273 = vmatpush.bf16.msra.mxu2 %v401_v11  ;;  %v400_v12 = vld [vmem:[#allocation8 + $0x30] sm:$0xff]  ;;  %v399_v13 = vld [vmem:[#allocation8 + $0x28] sm:$0xff]  ;;  %v398_v14 = vld [vmem:[#allocation8 + $0x20] sm:$0xff] }
  0x18   :  { %v397_v15 = vld [vmem:[#allocation8 + $0x18] sm:$0xff]  ;;  %v409_v16 = vld [vmem:[%s621_s2] ss:$0 sm:$0xff]  ;;  %v395_v23 = vld [vmem:[#allocation8 + $0x8] sm:$0xff] }
  0x19   :  { %191 = vmatpush.bf16.msra.mxu1 %v392_v4  ;;  %v396_v22 = vld [vmem:[#allocation8 + $0x10] sm:$0xff]  ;;  %v394_v24 = vld [vmem:[#allocation8] sm:$0xff] }
  0x1a   :  { %v410_v25 = vld [vmem:[%s623_s4] ss:$0 sm:$0xff]  ;;  %s554_s4 = smov [#allocation10]  }
  0x1b   :  { %274 = vmatpush.bf16.msra.mxu2 %v400_v12  ;;  %v411_v31 = vld [vmem:[%s625_s6] ss:$0 sm:$0xff]  ;;  %s302_s24 = sshll.u32 %s554_s4, 4  ;;  %s303_s24 = int_to_ptr.vmem [resolvable:$true] %s302_s24 }
  0x1d   :  { %192 = vmatpush.bf16.msra.mxu1 %v391_v5 }
  0x1f   :  { %275 = vmatpush.bf16.msra.mxu2 %v399_v13 }
  0x21   :  { %193 = vmatpush.bf16.msra.mxu1 %v390_v6 }
  0x23   :  { %276 = vmatpush.bf16.msra.mxu2 %v398_v14 }
  0x25   :  { %194 = vmatpush.bf16.msra.mxu1 %v389_v7 }
  0x27   :  { %277 = vmatpush.bf16.msra.mxu2 %v397_v15 }
  0x29   :  { %195 = vmatpush.bf16.msra.mxu1 %v388_v8 }
  0x2b   :  { %278 = vmatpush.bf16.msra.mxu2 %v396_v22 }
  0x2d   :  { %196 = vmatpush.bf16.msra.mxu1 %v387_v9 }
  0x2f   :  { %279 = vmatpush.bf16.msra.mxu2 %v395_v23 }
  0x31   :  { %197 = vmatpush.bf16.msra.mxu1 %v386_v10 }
  0x33   :  { %280 = vmatpush.bf16.msra.mxu2 %v394_v24 }
  0x94   :  { %v116_v17 = vpop.f32.mrf.mxu0 }
  0x95   :  { %v117_v18 = vadd.f32 %v409_v16, %v116_v17 }
  0x97   :  { %412 = vtanh.f32 %v117_v18 }
  0x9c   :  { %v118_v19 = vpop.f32.mrf.mxu0 }
  0x9d   :  { %v413_v20 = vpop.eup %412 }
  0x9e   :  { %v121_v21 = vpack.c.bf16 %v413_v20, %v413_v20 }
  0xa0   :  { %198 = vmatmul.bf16.vlgmr.msra.gmra.mxu1 %v121_v21 }
 0x11d   :  { %v199_v26 = vpop.f32.mrf.mxu1 }
 0x11e   :  { %v200_v27 = vadd.f32 %v410_v25, %v199_v26 }
 0x120   :  { %414 = vtanh.f32 %v200_v27 }
 0x125   :  { %v201_v28 = vpop.f32.mrf.mxu1 }
 0x126   :  { %v415_v29 = vpop.eup %414 }
 0x127   :  { %v204_v30 = vpack.c.bf16 %v415_v29, %v415_v29 }
 0x129   :  { %281 = vmatmul.bf16.vlgmr.msra.gmra.mxu2 %v204_v30 }
 0x1ac   :  { %v282_v32 = vpop.f32.mrf.mxu2 }
 0x1ad   :  { %v283_v33 = vadd.f32 %v411_v31, %v282_v32 }
 0x1af   :  { %286 = vmax.xlane.f32.xlu0 %v283_v33 }
 0x1b4   :  { %v284_v34 = vpop.f32.mrf.mxu2 }
 0x222   :  { %v287_v35 = vpop.xlane.xlu0 %286 }
 0x223   :  { %v288_v36 = vsub.f32 %v283_v33, %v287_v35 }
 0x225   :  { %v289_v37 = vmul.f32 1.442695, %v288_v36 }
 0x227   :  { %416 = vpow2.f32 %v289_v37 }
 0x22d   :  { %v417_v38 = vpop.eup %416 }
 0x22e   :  { %291 = vadd.xlane.f32.xlu0 %v417_v38 }
 0x2a1   :  { %v292_v39 = vpop.xlane.xlu0 %291 }
 0x2a2   :  { %418 = vrcp.f32 %v292_v39 }
 0x2a8   :  { %v419_v40 = vpop.eup %418 }
 0x2a9   :  { %v294_v41 = vmul.f32 %v419_v40, %v417_v38 }
 0x2ab   :  { %v295_v42 = vpack.c.bf16 %v294_v41, %v294_v41 }
 0x2ad   :  { %296 = vst [vmem:[#allocation10] sm:$0xf] %v295_v42 }
 0x2ae   :  { %307 = dma.vmem_to_hbm [thread:$0]  %s303_s24, 64, %s305_s27, [#allocation4]  }
 0x2af   :  { %546 = dma.done.wait [#allocation4], 64  }
 0x2b0   :  { %547 = vsyncadd [#allocation4], 4294967232 }
 0x2b1   :  { %312 = vsyncpa [#allocation3], 1 }
 0x2b2   :  { %313 = vsyncpa [#allocation6], 1 }
 0x2b3   :  { %314 = vsyncpa [#allocation9], 1 }
 0x2b4   :  { %315 = vsyncpa [#allocation4], 1 }

</bundles_post_ra>
